<compile_context>
chip_gen: v6e
topology: v6e:2x2x1
jax: 0.10.0
libtpu: 0.0.40
codegen_flags: <defaults>
</compile_context>

<pallas_src>
import jax
import jax.numpy as jnp
from jax import lax
from jax.experimental import pallas as pl
from jax.experimental.pallas import tpu as pltpu

# Small, module-consistent shapes.
B = 8          # batch
D_IN = 32      # input features
H = 64         # encoder hidden
E = 16         # embedding dim
C = 10         # number of classes / prototypes

D_PAD = 48     # D_IN + 1 (ones col) + zero pad, multiple of 16 (bf16 tile)
H_PAD = 128    # hidden padded to lane width; column 64 is the constant-1 col
C_PAD = 128    # classes padded to lane width
NEG = -1.0e9   # padded-class bias: can never win the argmax


def fedhp_kernel(x_ref, p_ref, out_ref):
    # Packed parameter buffer layout (bf16, [176, 128]):
    #   rows   0.. 47 : W1A  [D_PAD, H_PAD]   (W1 | b1-row | constant-1 hook)
    #   rows  48..175 : MP   [H_PAD, C_PAD]   (W2 @ Pn.T | head-bias row | NEG pad)
    w1a = p_ref[pl.ds(0, D_PAD), :]          # [48, 128] bf16 (tile-aligned slice)
    mp = p_ref[pl.ds(D_PAD, H_PAD), :]       # [128, 128] bf16

    # Encoder layer: one MXU matmul (bias folded via the ones column), f32 acc,
    # ReLU in f32.  h[:, 64] == 1 carries the folded head bias; h[:, 65:] == 0.
    h = jnp.maximum(
        jnp.dot(x_ref[...], w1a, preferred_element_type=jnp.float32), 0.0
    )                                                                 # [B, 128] f32

    # Folded head (W2 @ normalized-prototypes + biases): one MXU matmul.
    logits = jnp.dot(
        h.astype(jnp.bfloat16), mp, preferred_element_type=jnp.float32
    )                                                                 # [B, 128] f32

    # argmax over the full 128 lanes (padded classes sit at -1e9).
    # First-maximal index on ties, matching torch.
    m = jnp.max(logits, axis=1, keepdims=True)                        # [B, 1]
    idx = lax.broadcasted_iota(jnp.int32, logits.shape, 1)            # [B, 128]
    masked = jnp.where(logits == m, idx, jnp.int32(C_PAD))            # [B, 128]
    arg = jnp.min(masked, axis=1, keepdims=True)                      # [B, 1] int32

    # Lane-dense store: full unmasked (B, 128) int32 vreg store.
    out_ref[...] = jnp.broadcast_to(arg, out_ref.shape)


def build_params(w1, b1, w2, b2, protos):
    """One-time parameter prep (per parameter update, outside the hot path):
    normalize prototypes, fold the second linear layer + both biases into a
    single packed bf16 buffer [D_PAD + H_PAD, 128]."""
    pn = protos * lax.rsqrt(jnp.sum(protos * protos, axis=1, keepdims=True) + 1e-12)
    m = w2 @ pn.T                                  # [H, C]
    c = b2 @ pn.T                                  # [1, C]

    w1a = jnp.zeros((D_PAD, H_PAD), jnp.float32)
    w1a = w1a.at[:D_IN, :H].set(w1)                # W1
    w1a = w1a.at[D_IN, :H].set(b1[0])              # b1 rides on the ones column
    w1a = w1a.at[D_IN, H].set(1.0)                 # makes h[:, H] == 1 (bias hook)

    mp = jnp.zeros((H_PAD, C_PAD), jnp.float32)
    mp = mp.at[:H, :C].set(m)                      # W2 @ Pn.T
    mp = mp.at[H, :].set(NEG)                      # padded classes -> -1e9
    mp = mp.at[H, :C].set(c[0])                    # real head bias

    packed = jnp.concatenate([w1a, mp], axis=0).astype(jnp.bfloat16)  # [176, 128]
    return packed


def _prep_x(x):
    """Append the constant-1 column and zero-pad features to D_PAD, cast bf16."""
    xa = jnp.zeros((x.shape[0], D_PAD), jnp.float32)
    xa = xa.at[:, :D_IN].set(x)
    xa = xa.at[:, D_IN].set(1.0)
    return xa.astype(jnp.bfloat16)


@jax.jit
def fedhp_forward(x, packed):
    # Gridless single invocation: both operands fully VMEM-resident
    # (total footprint ~50 KiB).  Prep + kernel + slice fuse into one
    # executable under this jit.
    xa = _prep_x(x)
    vmem = pl.BlockSpec(memory_space=pltpu.MemorySpace.VMEM)
    out = pl.pallas_call(
        fedhp_kernel,
        out_shape=jax.ShapeDtypeStruct((x.shape[0], C_PAD), jnp.int32),
        in_specs=[vmem, vmem],
        out_specs=vmem,
    )(xa, packed)
    return out[:, 0]  # [B] int32


def _emulate_kernel(x, packed):
    """Pure-JAX replica of the exact kernel math (bf16 matmuls, f32 acc)."""
    xa = _prep_x(x)
    h = jnp.maximum(
        jnp.dot(xa, packed[:D_PAD], preferred_element_type=jnp.float32), 0.0)
    logits = jnp.dot(h.astype(jnp.bfloat16), packed[D_PAD:],
                     preferred_element_type=jnp.float32)
    return jnp.argmax(logits, axis=1).astype(jnp.int32)


def _ref_forward(x, w1, b1, w2, b2, protos):
    """Pure-JAX f32 reference of the ORIGINAL (unfused, normalized) forward."""
    h = jnp.maximum(x @ w1 + b1, 0.0)
    z = h @ w2 + b2
    zn = z / jnp.sqrt(jnp.sum(z * z, axis=1, keepdims=True) + 1e-12)
    pn = protos / jnp.sqrt(jnp.sum(protos * protos, axis=1, keepdims=True) + 1e-12)
    logits = zn @ pn.T
    return jnp.argmax(logits, axis=1).astype(jnp.int32)


if __name__ == "__main__":
    key = jax.random.PRNGKey(0)
    kx, k1, k2, k3, k4, k5 = jax.random.split(key, 6)

    x = jax.random.normal(kx, (B, D_IN), dtype=jnp.float32)

    # Deterministic parameter init (PyTorch-Linear-like uniform scaling).
    w1 = jax.random.uniform(k1, (D_IN, H), jnp.float32, -1.0, 1.0) / jnp.sqrt(D_IN)
    b1 = jax.random.uniform(k2, (1, H), jnp.float32, -1.0, 1.0) / jnp.sqrt(D_IN)
    w2 = jax.random.uniform(k3, (H, E), jnp.float32, -1.0, 1.0) / jnp.sqrt(H)
    b2 = jax.random.uniform(k4, (1, E), jnp.float32, -1.0, 1.0) / jnp.sqrt(H)
    protos = jax.random.normal(k5, (C, E), dtype=jnp.float32)

    # One-time parameter folding / packing.
    packed = build_params(w1, b1, w2, b2, protos)

    out = fedhp_forward(x, packed)
    out = jax.block_until_ready(out)

    assert out.shape == (B,) and out.dtype == jnp.int32

    # Strict check: bit-exact vs. a pure-JAX replica of the kernel's math.
    ref_bf16 = _emulate_kernel(x, packed)
    assert bool(jnp.all(out == ref_bf16)), (out, ref_bf16)

    # Robust check vs. the original f32 reference: bf16 rounding may only flip
    # the argmax at near-ties, so any disagreement must be at a small top-2
    # gap in the (unnormalized, folded) f32 logits.
    ref32 = _ref_forward(x, w1, b1, w2, b2, protos)
    pn = protos * lax.rsqrt(jnp.sum(protos * protos, axis=1, keepdims=True) + 1e-12)
    logits_fold = jnp.maximum(x @ w1 + b1, 0.0) @ (w2 @ pn.T) + b2 @ pn.T
    srt = jnp.sort(logits_fold, axis=1)
    gap = srt[:, -1] - srt[:, -2]
    assert bool(jnp.all((out == ref32) | (gap < 0.1))), (out, ref32, gap)

    print("KERNEL_OK")
</pallas_src>

<mosaic_0001>
module attributes {stable_mosaic.version = 11 : i64} {
  func.func @fedhp_kernel(%arg0: memref<8x48xbf16, #tpu.memory_space<vmem>>, %arg1: memref<176x128xbf16, #tpu.memory_space<vmem>>, %arg2: memref<8x128xi32, #tpu.memory_space<vmem>>) attributes {dimension_semantics = [], scalar_prefetch = 0 : i64, scratch_operands = 0 : i64, tpu.core_type = #tpu.core_type<tc>} {
    %c0 = arith.constant 0 : index
    %c0_0 = arith.constant 0 : index
    %0 = vector.load %arg1[%c0, %c0_0] : memref<176x128xbf16, #tpu.memory_space<vmem>>, vector<48x128xbf16>
    %c48 = arith.constant 48 : index
    %c0_1 = arith.constant 0 : index
    %1 = vector.load %arg1[%c48, %c0_1] : memref<176x128xbf16, #tpu.memory_space<vmem>>, vector<128x128xbf16>
    %c0_2 = arith.constant 0 : index
    %c0_3 = arith.constant 0 : index
    %2 = vector.load %arg0[%c0_2, %c0_3] : memref<8x48xbf16, #tpu.memory_space<vmem>>, vector<8x48xbf16>
    %cst = arith.constant dense<0.000000e+00> : vector<8x128xf32>
    %3 = tpu.matmul %2, %0, %cst {dimension_numbers = #tpu.dot_dimension_numbers<[1], [0], [0], [1], [0, 0, 1, 1], [], []>} : vector<8x48xbf16>, vector<48x128xbf16>, vector<8x128xf32> -> vector<8x128xf32>
    %cst_4 = arith.constant 0.000000e+00 : f32
    %4 = vector.broadcast %cst_4 : f32 to vector<8x128xf32>
    %5 = arith.maximumf %3, %4 : vector<8x128xf32>
    %6 = arith.truncf %5 : vector<8x128xf32> to vector<8x128xbf16>
    %cst_5 = arith.constant dense<0.000000e+00> : vector<8x128xf32>
    %7 = tpu.matmul %6, %1, %cst_5 {dimension_numbers = #tpu.dot_dimension_numbers<[1], [0], [0], [1], [0, 0, 1, 1], [], []>} : vector<8x128xbf16>, vector<128x128xbf16>, vector<8x128xf32> -> vector<8x128xf32>
    %cst_6 = arith.constant dense<0xFF800000> : vector<8xf32>
    %8 = vector.multi_reduction <maximumf>, %7, %cst_6 [1] : vector<8x128xf32> to vector<8xf32>
    %9 = vector.shape_cast %8 : vector<8xf32> to vector<8x1xf32>
    %10 = tpu.iota {dimensions = array<i32: 1>} : vector<8x128xi32>
    %11 = vector.broadcast %9 : vector<8x1xf32> to vector<8x128xf32>
    %12 = arith.cmpf oeq, %7, %11 : vector<8x128xf32>
    %c128_i32 = arith.constant 128 : i32
    %13 = vector.broadcast %c128_i32 : i32 to vector<8x128xi32>
    %14 = arith.select %12, %10, %13 : vector<8x128xi1>, vector<8x128xi32>
    %cst_7 = arith.constant dense<2147483647> : vector<8xi32>
    %15 = vector.multi_reduction <minsi>, %14, %cst_7 [1] : vector<8x128xi32> to vector<8xi32>
    %16 = vector.shape_cast %15 : vector<8xi32> to vector<8x1xi32>
    %17 = vector.shape_cast %16 : vector<8x1xi32> to vector<8x1xi32>
    %18 = vector.broadcast %17 : vector<8x1xi32> to vector<8x128xi32>
    %c0_8 = arith.constant 0 : index
    %c0_9 = arith.constant 0 : index
    %19 = vector.load %arg2[%c0_8, %c0_9] : memref<8x128xi32, #tpu.memory_space<vmem>>, vector<8x128xi32>
    tpu.vector_store %arg2[%c0_8, %c0_9], %18 {strides = array<i32>} : memref<8x128xi32, #tpu.memory_space<vmem>>, vector<8x128xi32>,
    return
  }
}

</mosaic_0001>

<bundles_post_ra>
// kernel: fedhp_forward.1
= control target key start
LH: loop header
LB: loop body
LE: loop exit
PB: predicated region body
PF: predicated region fallthrough
CT: control target
= control target key end

     0   :  { %7 = vsyncpa [#allocation3], 0  ;;  %s320_s9 = smov [#allocation2]   ;;  %s349_s0 = inlined_call_operand.vmem [shape: bf16[8,48], index: 0, kind: input, shape index: {}]   ;;  %s350_s1 = inlined_call_operand.hbm [shape: bf16[176,128], index: 1, kind: input, shape index: {}]   ;;  %s351_s2 = inlined_call_operand.vmem [shape: s32[8,128], index: 2, kind: output, shape index: {}]  }
   0x1   :  { %s15_s10 = sshll.u32 %s320_s9, 4  ;;  %s16_s10 = int_to_ptr.vmem [resolvable:$true] %s15_s10 }
   0x2   :  { %s306_s11 = scalar_lea.vmem %s16_s10, 1408  ;;  %p311_p1 = scmp.lt.s32.totalorder %s16_s10, %s16_s10 }
   0x3   :  { %p307_p0 = scmp.ne.s32.totalorder %s16_s10, %s306_s11  ;;  %p312_p2 = scmp.lt.s32.totalorder %s306_s11, %s306_s11 }
   0x5   :  { %p313_p3 = por %p312_p2, %p311_p1 }
   0x7   :  { %p314_p4 = pnand %p313_p3, %p307_p0 }
   0x9   :  { %317 = shalt.err (!%p314_p4)
}
   0xa   :  { %s321_s12 = smov 64   ;;  %s322_s13 = smov 4  }
   0xb   :  { %21 = dma.hbm_to_vmem [thread:$0]  %s350_s1, 1408, %s16_s10, [#allocation3], %s321_s12, %s321_s12, %s322_s13  }
   0xc   :  { %318 = dma.done.wait [#allocation3], 1408  }
   0xd   :  { %319 = vsyncadd [#allocation3], 4294965888  ;;  %v323_v0 = vmov 0.0   ;;  %vm324_vm0 = vmmov 0   ;;  %v287_v1 = vld [vmem:[#allocation2 + $0x10] sm:$0xff]   ;;  %v288_v2 = vld [vmem:[#allocation2 + $0x8] sm:$0xff]   ;;  %v203_v23 = vlaneseq }
   0xe   :  { %252 = vmatprep.subr.bf16.mxu0 %v323_v0  ;;  %258 = vmatprep.mubr.msk.bf16.mxu0 %vm324_vm0, %v323_v0  ;;  %v290_v3 = vld [vmem:[#allocation2 + $0x50] sm:$0xff]   ;;  %v289_v4 = vld [vmem:[#allocation2] sm:$0xff]   ;;  %v291_v5 = vld [vmem:[#allocation2 + $0x48] sm:$0xff]   ;;  %vm67_vm1 = vcmask 392192  }
   0xf   :  { %262 = vmatprep.subr.bf16.mxu1 %v323_v0  ;;  %278 = vmatprep.mubr.msk.bf16.mxu1 %vm324_vm0, %v323_v0  ;;  %v48_v6 = vld [vmem:[%s349_s0] sm:$0xf]  ;;  %v293_v8 = vld [vmem:[#allocation2 + $0x38] sm:$0xff]   ;;  %v294_v9 = vld [vmem:[#allocation2 + $0x30] sm:$0xff]   ;;  %v204_v24 = vand.u32 127, %v203_v23 }
  0x10   :  { %253 = vmatpush3.bf16.msra.mxu0 %v287_v1  ;;  %263 = vmatpush3.bf16.msra.mxu1 %v290_v3  ;;  %v292_v7 = vld [vmem:[#allocation2 + $0x40] sm:$0xff]   ;;  %v295_v10 = vld [vmem:[#allocation2 + $0x28] sm:$0xff]   ;;  %v297_v12 = vld [vmem:[#allocation2 + $0x18] sm:$0xff]  }
  0x11   :  { %254 = vmatprep.subr.bf16.mxu0 %v323_v0  ;;  %264 = vmatprep.subr.bf16.mxu1 %v323_v0  ;;  %v296_v11 = vld [vmem:[#allocation2 + $0x20] sm:$0xff]  }
  0x14   :  { %255 = vmatpush3.bf16.msra.mxu0 %v288_v2  ;;  %265 = vmatpush3.bf16.msra.mxu1 %v291_v5 }
  0x15   :  { %256 = vmatprep.subr.bf16.mxu0 %v323_v0  ;;  %266 = vmatprep.subr.bf16.mxu1 %v323_v0 }
  0x18   :  { %257 = vmatpush3.bf16.msra.mxu0 %v289_v4  ;;  %267 = vmatpush3.bf16.msra.mxu1 %v292_v7 }
  0x19   :  { %268 = vmatprep.subr.bf16.mxu1 %v323_v0 }
  0x1b   :  { %259 = vmatmul.mubr.msk.bf16.vlgmr.msra.gmra.mxu0 %vm67_vm1, %v48_v6 }
  0x1c   :  { %269 = vmatpush3.bf16.msra.mxu1 %v293_v8 }
  0x1d   :  { %270 = vmatprep.subr.bf16.mxu1 %v323_v0 }
  0x20   :  { %271 = vmatpush3.bf16.msra.mxu1 %v294_v9 }
  0x21   :  { %272 = vmatprep.subr.bf16.mxu1 %v323_v0 }
  0x24   :  { %273 = vmatpush3.bf16.msra.mxu1 %v295_v10 }
  0x25   :  { %274 = vmatprep.subr.bf16.mxu1 %v323_v0 }
  0x28   :  { %275 = vmatpush3.bf16.msra.mxu1 %v296_v11 }
  0x29   :  { %276 = vmatprep.subr.bf16.mxu1 %v323_v0 }
  0x2c   :  { %277 = vmatpush3.bf16.msra.mxu1 %v297_v12 }
  0xdb   :  { %v105_v13 = vpop.f32.mrf.mxu0 }
  0xdc   :  { %v111_v14 = vmax.f32 %v105_v13, 0.0 }
  0xdd   :  { %v260_v15 = vpop.f32.mrf.mxu0 }
  0xde   :  { %v112_v16 = vpack.c.bf16 %v111_v14, %v111_v14 }
  0xdf   :  { %v108_v17 = vpop.f32.mrf.mxu0 }
  0xe0   :  { %279 = vmatmul.mubr.bf16.vlgmr.msra.gmra.mxu1 %v112_v16 }
  0xe1   :  { %v261_v18 = vpop.f32.mrf.mxu0 }
 0x1a0   :  { %v195_v19 = vpop.f32.mrf.mxu1 }
 0x1a1   :  { %201 = vmax.xlane.f32.xlu0 %v195_v19 }
 0x1a2   :  { %v280_v20 = vpop.f32.mrf.mxu1 }
 0x1a4   :  { %v198_v21 = vpop.f32.mrf.mxu1 }
 0x1a6   :  { %v281_v22 = vpop.f32.mrf.mxu1 }
 0x22a   :  { %v202_v25 = vpop.xlane.xlu0 %201 }
 0x22b   :  { %vm205_vm2 = vcmp.eq.f32.partialorder %v195_v19, %v202_v25 }
 0x22c   :  { %v206_v26 = vsel %vm205_vm2, %v204_v24, 128 }
 0x22d   :  { %v208_v27 = vshra.s32 %v206_v26, 16  ;;  %v207_v29 = vand.u32 65535, %v206_v26 }
 0x22f   :  { %v210_v28 = vcvt.s32.f32 %v208_v27  ;;  %v209_v31 = vcvt.s32.f32 %v207_v29 }
 0x231   :  { %211 = vmin.xlane.f32.xlu0 %v210_v28 }
 0x2ba   :  { %v212_v30 = vpop.xlane.xlu0 %211 }
 0x2bb   :  { %vm213_vm3 = vcmp.eq.f32.partialorder %v210_v28, %v212_v30  ;;  %v218_v33 = vcvt.f32.s32 %v212_v30 }
 0x2bc   :  { %v214_v32 = vsel %vm213_vm3, %v209_v31, inf }
 0x2bd   :  { %215 = vmin.xlane.f32.xlu1 %v214_v32  ;;  %v219_v35 = vshll.u32 %v218_v33, 16 }
 0x346   :  { %v216_v34 = vpop.xlane.xlu1 %215 }
 0x347   :  { %v217_v36 = vcvt.f32.s32 %v216_v34 }
 0x349   :  { %v220_v37 = vadd.s32 %v219_v35, %v217_v36 }
 0x34b   :  { %221 = vst [vmem:[%s351_s2] sm:$0xff] %v220_v37 }
 0x34c   :  { %226 = vsyncpa [#allocation3], 1 }

</bundles_post_ra>
